<compile_context>
chip_gen: v5e
topology: v5e:2x2
jax: 0.10.0
libtpu: 0.0.40
codegen_flags: <defaults>
</compile_context>

<pallas_src>
import functools

import jax
import jax.numpy as jnp
from jax.experimental import pallas as pl
from jax.experimental.pallas import tpu as pltpu


# -----------------------------------------------------------------------------
# Pallas kernels — hot path: per-element loss + per-query reductions.
# Refs per grid block i (block_bn queries on lanes):
#   logits_ref : (2, T, bn)  model dtype  -- class-0 / class-1 logit slabs
#   tgt_ref    : (T, bn)     f32          -- 0/1 referred labels
#   loss_q_ref : (1, bn)     f32          -- per-query loss, mean over T
#   pos_ref    : (1, bn)     f32          -- #frames with argmax == 1 per query
# -----------------------------------------------------------------------------

def _pos_count(z0, z1):
    # cardinality: softmax argmax == 1  <=>  z1 > z0 (ties -> class 0, as torch)
    return jnp.sum((z1 > z0).astype(jnp.float32), axis=0, keepdims=True)


def _focal_modulator(one_minus_pt, gamma):
    one_minus_pt = jnp.maximum(one_minus_pt, 0.0)     # guard fp rounding < 0
    if gamma == 2.0:                                  # trace-time specialization
        return one_minus_pt * one_minus_pt
    return one_minus_pt ** gamma


def _referred_softmax_kernel(logits_ref, tgt_ref, loss_q_ref, pos_ref,
                             *, eos_coef, inv_t):
    z0 = logits_ref[0].astype(jnp.float32)            # (T, bn)
    z1 = logits_ref[1].astype(jnp.float32)            # (T, bn)
    t = tgt_ref[...]                                  # (T, bn) in {0,1}

    # numerically-stable log-softmax over the 2 classes
    m = jnp.maximum(z0, z1)
    lse = m + jnp.log(jnp.exp(z0 - m) + jnp.exp(z1 - m))
    logp0 = z0 - lse
    logp1 = z1 - lse

    # F.cross_entropy(weight=[eos_coef, 1], reduction='none'):
    #   loss = -weight[y] * log_softmax(x)[y]
    loss_el = -(t * logp1 + eos_coef * (1.0 - t) * logp0)          # (T, bn)

    loss_q_ref[...] = jnp.sum(loss_el, axis=0, keepdims=True) * inv_t
    pos_ref[...] = _pos_count(z0, z1)


def _referred_sigmoid_focal_kernel(logits_ref, tgt_ref, loss_q_ref, pos_ref,
                                   *, alpha, gamma, inv_t):
    z0 = logits_ref[0].astype(jnp.float32)
    z1 = logits_ref[1].astype(jnp.float32)
    t1 = tgt_ref[...]

    def focal(x, tc):
        p = jax.nn.sigmoid(x)
        # BCE-with-logits (stable form)
        ce = jnp.maximum(x, 0.0) - x * tc + jnp.log1p(jnp.exp(-jnp.abs(x)))
        p_t = p * tc + (1.0 - p) * (1.0 - tc)
        a_t = alpha * tc + (1.0 - alpha) * (1.0 - tc)
        return a_t * ce * _focal_modulator(1.0 - p_t, gamma)

    # sum the two one-hot channels elementwise, then a single reduction
    loss_el = focal(z1, t1) + focal(z0, 1.0 - t1)                  # (T, bn)

    loss_q_ref[...] = jnp.sum(loss_el, axis=0, keepdims=True) * inv_t
    pos_ref[...] = _pos_count(z0, z1)


def _referred_softmax_focal_kernel(logits_ref, tgt_ref, loss_q_ref, pos_ref,
                                   *, alpha, gamma, inv_t):
    z0 = logits_ref[0].astype(jnp.float32)
    z1 = logits_ref[1].astype(jnp.float32)
    t1 = tgt_ref[...]

    m = jnp.maximum(z0, z1)
    e0 = jnp.exp(z0 - m)
    e1 = jnp.exp(z1 - m)
    s = e0 + e1
    lse = m + jnp.log(s)
    logp0 = z0 - lse
    logp1 = z1 - lse

    # Two-class identities (exact): log(1 - p1) == logp0, log(1 - p0) == logp1,
    # hence ce and p_t are identical for both one-hot channels and the two
    # alpha_t weights sum to alpha + (1 - alpha) == 1.  The per-element sum
    # over the class axis of the PyTorch focal loss therefore collapses to:
    #   ce * (1 - p_t)**gamma
    ce = -(t1 * logp1 + (1.0 - t1) * logp0)
    p_t = (t1 * e1 + (1.0 - t1) * e0) / s
    loss_el = ce * _focal_modulator(1.0 - p_t, gamma)              # (T, bn)

    loss_q_ref[...] = jnp.sum(loss_el, axis=0, keepdims=True) * inv_t
    pos_ref[...] = _pos_count(z0, z1)


def _pick_block_bn(bn):
    """Single block for small problems; 128-multiple tiles for large BN so the
    grid axis can be sharded across v7x TensorCores and VMEM stays bounded."""
    if bn <= 2048:
        return bn
    for blk in (2048, 1024, 512, 256, 128):
        if bn % blk == 0:
            return blk
    return bn


def _run_referred_kernel(kernel_body, logits_2tbn, tgt_tbn):
    """logits_2tbn: (2, T, BN) model dtype ; tgt_tbn: (T, BN) f32.
    Returns (per-query loss (1, BN) f32, per-query positive count (1, BN) f32)."""
    _, T, BN = logits_2tbn.shape
    block_bn = _pick_block_bn(BN)
    grid_bn = BN // block_bn
    return pl.pallas_call(
        kernel_body,
        grid=(grid_bn,),
        in_specs=[
            pl.BlockSpec((2, T, block_bn), lambda i: (0, 0, i)),
            pl.BlockSpec((T, block_bn), lambda i: (0, i)),
        ],
        out_specs=[
            pl.BlockSpec((1, block_bn), lambda i: (0, i)),
            pl.BlockSpec((1, block_bn), lambda i: (0, i)),
        ],
        out_shape=[
            jax.ShapeDtypeStruct((1, BN), jnp.float32),
            jax.ShapeDtypeStruct((1, BN), jnp.float32),
        ],
        compiler_params=pltpu.CompilerParams(
            dimension_semantics=("parallel",)),
    )(logits_2tbn, tgt_tbn)


# -----------------------------------------------------------------------------
# SetCriterion wrapper (glue in plain JAX).
# -----------------------------------------------------------------------------

class SetCriterionPallas:
    def __init__(self, weight_dict, eos_coef=0.1, alpha=0.25, gamma=2.0,
                 referred_loss_type='softmax'):
        self.weight_dict = weight_dict
        self.eos_coef = float(eos_coef)
        self.alpha = float(alpha)
        self.gamma = float(gamma)
        losses_to_compute = []
        if weight_dict['loss_boxes'] > 0 or weight_dict['loss_giou'] > 0:
            losses_to_compute.append('boxes')
        if weight_dict['loss_is_referred'] > 0:
            losses_to_compute.append('cardinality')
            if referred_loss_type == 'softmax':
                losses_to_compute.append('is_referred_softmax')
            elif referred_loss_type == 'softmax_focal_loss':
                losses_to_compute.append('is_referred_softmax_focal_loss')
            elif referred_loss_type == 'sigmoid_focal_loss':
                losses_to_compute.append('is_referred_sigmoid_focal_loss')
            else:
                raise ValueError(f'Unknown referred_loss_type {referred_loss_type}')
        self.losses = losses_to_compute

    # ---- glue: build the (T, B*N) target tensor from matcher indices -------
    @staticmethod
    def _build_target_is_referred(targets, indices, B, N, T):
        # Built directly in the kernel's lane-dense (T, B*N) layout with a
        # single scatter (instead of B per-batch scatters on a (B,N,T) tensor).
        q_idx, rows = [], []
        for b, (t, (src_idx, tgt_idx)) in enumerate(zip(targets, indices)):
            referred = jnp.asarray(t['referred'], jnp.float32)      # (n_tgt, T)
            q_idx.append(jnp.asarray(src_idx, jnp.int32) + b * N)
            rows.append(referred[jnp.asarray(tgt_idx, jnp.int32)])  # (n_b, T)
        q_idx = jnp.concatenate(q_idx)                              # (M,)
        rows = jnp.concatenate(rows, axis=0)                        # (M, T)
        tgt = jnp.zeros((T, B * N), jnp.float32)
        return tgt.at[:, q_idx].set(rows.T)                         # (T, B*N)
        # TODO(synk): could be fused into the kernel with scalar-prefetched
        # indices + an in-kernel lane gather; kept in XLA for robustness.

    def forward(self, outputs, targets, indices):
        """outputs['pred_is_referred']: (T, B, N, 2), any float dtype."""
        pred = outputs['pred_is_referred']
        T, B, N, C = pred.shape
        assert C == 2
        BN = B * N

        # Single relayout pass to the lane-dense kernel layout: class axis
        # leading, queries on lanes.  Keep the model dtype — cast to f32
        # happens in-kernel after the (cheaper) DMA.
        logits = jnp.transpose(pred.reshape(T, BN, 2), (2, 0, 1))   # (2, T, BN)
        tgt = self._build_target_is_referred(targets, indices, B, N, T)

        losses = {}
        pos = None
        if 'is_referred_softmax' in self.losses:
            kbody = functools.partial(_referred_softmax_kernel,
                                      eos_coef=self.eos_coef, inv_t=1.0 / T)
            loss_q, pos = _run_referred_kernel(kbody, logits, tgt)
            losses['loss_is_referred'] = jnp.sum(loss_q) / B
        elif 'is_referred_sigmoid_focal_loss' in self.losses:
            kbody = functools.partial(_referred_sigmoid_focal_kernel,
                                      alpha=self.alpha, gamma=self.gamma,
                                      inv_t=1.0 / T)
            loss_q, pos = _run_referred_kernel(kbody, logits, tgt)
            losses['loss_is_referred'] = jnp.sum(loss_q) / B
        elif 'is_referred_softmax_focal_loss' in self.losses:
            kbody = functools.partial(_referred_softmax_focal_kernel,
                                      alpha=self.alpha, gamma=self.gamma,
                                      inv_t=1.0 / T)
            loss_q, pos = _run_referred_kernel(kbody, logits, tgt)
            losses['loss_is_referred'] = jnp.sum(loss_q) / B

        if 'cardinality' in self.losses and pos is not None:
            pred_pos = pos.reshape(B, N).sum(axis=-1)               # (B,)
            tgt_lengths = jnp.asarray(
                [int(jnp.asarray(t['referred']).size) for t in targets],
                jnp.float32)
            losses['cardinality_error'] = jnp.mean(
                jnp.abs(pred_pos - tgt_lengths))

        # TODO(synk): 'boxes' loss (track_distance / generalized_track_iou)
        # not implemented — external helpers are not part of this module.
        return losses


# -----------------------------------------------------------------------------
# Pure-JAX references (mirror the PyTorch op order) for correctness checks.
# -----------------------------------------------------------------------------
def _ref_softmax(pred, tgt_tbn, eos_coef):
    T, B, N, _ = pred.shape
    t = tgt_tbn.reshape(T, B, N)
    logp = jax.nn.log_softmax(pred.astype(jnp.float32), axis=-1)    # (T,B,N,2)
    picked = jnp.where(t > 0.5, logp[..., 1], logp[..., 0])
    w = jnp.where(t > 0.5, 1.0, eos_coef)
    loss = -(w * picked)                                            # (T,B,N)
    return loss.mean(0).sum() / B                                   # mean over T


def _ref_sigmoid_focal(pred, tgt_tbn, alpha, gamma):
    T, B, N, _ = pred.shape
    t = tgt_tbn.reshape(T, B, N)
    onehot = jnp.stack([1.0 - t, t], axis=-1)                       # (T,B,N,2)
    x = pred.astype(jnp.float32)
    p = jax.nn.sigmoid(x)
    ce = jnp.maximum(x, 0.0) - x * onehot + jnp.log1p(jnp.exp(-jnp.abs(x)))
    p_t = p * onehot + (1.0 - p) * (1.0 - onehot)
    loss = ce * (1.0 - p_t) ** gamma
    loss = (alpha * onehot + (1.0 - alpha) * (1.0 - onehot)) * loss
    return loss.mean(0).sum() / B


def _ref_softmax_focal(pred, tgt_tbn, alpha, gamma):
    T, B, N, _ = pred.shape
    t = tgt_tbn.reshape(T, B, N)
    onehot = jnp.stack([1.0 - t, t], axis=-1)
    prob = jax.nn.softmax(pred.astype(jnp.float32), axis=-1)
    ce = -jnp.log(prob) * onehot + -jnp.log(1.0 - prob) * (1.0 - onehot)
    p_t = prob * onehot + (1.0 - prob) * (1.0 - onehot)
    loss = ce * (1.0 - p_t) ** gamma
    loss = (alpha * onehot + (1.0 - alpha) * (1.0 - onehot)) * loss
    return loss.mean(0).sum() / B


def _ref_cardinality(pred, tgt_lengths):
    pred_pos = (jnp.argmax(pred, axis=-1) == 1).sum(axis=(0, 2)).astype(jnp.float32)
    return jnp.mean(jnp.abs(pred_pos - tgt_lengths))


if __name__ == "__main__":
    key = jax.random.PRNGKey(0)
    T, B, N = 8, 2, 8

    k1, k2, k3 = jax.random.split(key, 3)
    pred_is_referred = jax.random.normal(k1, (T, B, N, 2), jnp.float32)

    # synthetic targets: batch 0 has 3 tracks, batch 1 has 2 tracks
    targets = [
        {'referred': (jax.random.uniform(k2, (3, T)) > 0.5).astype(jnp.int32),
         'boxes': jnp.zeros((3, T, 4), jnp.float32)},
        {'referred': (jax.random.uniform(k3, (2, T)) > 0.5).astype(jnp.int32),
         'boxes': jnp.zeros((2, T, 4), jnp.float32)},
    ]
    # TODO(synk): indices would normally come from the Hungarian matcher.
    indices = [
        (jnp.array([1, 4, 6], jnp.int32), jnp.array([0, 1, 2], jnp.int32)),
        (jnp.array([0, 3], jnp.int32), jnp.array([1, 0], jnp.int32)),
    ]
    weight_dict = {'loss_is_referred': 2.0, 'loss_boxes': 0.0, 'loss_giou': 0.0}

    tgt_tbn = SetCriterionPallas._build_target_is_referred(targets, indices, B, N, T)
    tgt_lengths = jnp.asarray(
        [int(jnp.asarray(t['referred']).size) for t in targets], jnp.float32)
    ref_card = _ref_cardinality(pred_is_referred, tgt_lengths)

    ref_fns = {
        'softmax': lambda: _ref_softmax(pred_is_referred, tgt_tbn, 0.1),
        'softmax_focal_loss': lambda: _ref_softmax_focal(pred_is_referred, tgt_tbn, 0.25, 2.0),
        'sigmoid_focal_loss': lambda: _ref_sigmoid_focal(pred_is_referred, tgt_tbn, 0.25, 2.0),
    }

    for loss_type, ref_fn in ref_fns.items():
        criterion = SetCriterionPallas(weight_dict, eos_coef=0.1,
                                       alpha=0.25, gamma=2.0,
                                       referred_loss_type=loss_type)
        losses = criterion.forward({'pred_is_referred': pred_is_referred},
                                   targets, indices)
        losses = jax.tree_util.tree_map(jax.block_until_ready, losses)

        ref_loss = ref_fn()
        assert jnp.allclose(losses['loss_is_referred'], ref_loss,
                            rtol=1e-4, atol=1e-4), \
            (loss_type, losses['loss_is_referred'], ref_loss)
        assert jnp.allclose(losses['cardinality_error'], ref_card,
                            rtol=1e-4, atol=1e-4), \
            (loss_type, losses['cardinality_error'], ref_card)

    print("KERNEL_OK")
</pallas_src>

<mosaic_0001>
module attributes {stable_mosaic.version = 11 : i64} {
  func.func @_referred_softmax_kernel(%arg0: i32, %arg1: memref<2x8x16xf32, #tpu.memory_space<vmem>>, %arg2: memref<8x16xf32, #tpu.memory_space<vmem>>, %arg3: memref<1x16xf32, #tpu.memory_space<vmem>>, %arg4: memref<1x16xf32, #tpu.memory_space<vmem>>) attributes {dimension_semantics = [#tpu.dimension_semantics<parallel>], iteration_bounds = array<i64: 1>, scalar_prefetch = 0 : i64, scratch_operands = 0 : i64, tpu.core_type = #tpu.core_type<tc>, window_params = [{transform_indices = @transform_0, window_bounds = array<i64: 2, 8, 16>}, {transform_indices = @transform_1, window_bounds = array<i64: 8, 16>}, {transform_indices = @transform_2, window_bounds = array<i64: 1, 16>}, {transform_indices = @transform_3, window_bounds = array<i64: 1, 16>}]} {
    %c0 = arith.constant 0 : index
    %c0_0 = arith.constant 0 : index
    %c0_1 = arith.constant 0 : index
    %0 = vector.load %arg1[%c0, %c0_0, %c0_1] : memref<2x8x16xf32, #tpu.memory_space<vmem>>, vector<1x8x16xf32>
    %1 = vector.shape_cast %0 : vector<1x8x16xf32> to vector<8x16xf32>
    %c1 = arith.constant 1 : index
    %c0_2 = arith.constant 0 : index
    %c0_3 = arith.constant 0 : index
    %2 = vector.load %arg1[%c1, %c0_2, %c0_3] : memref<2x8x16xf32, #tpu.memory_space<vmem>>, vector<1x8x16xf32>
    %3 = vector.shape_cast %2 : vector<1x8x16xf32> to vector<8x16xf32>
    %c0_4 = arith.constant 0 : index
    %c0_5 = arith.constant 0 : index
    %4 = vector.load %arg2[%c0_4, %c0_5] : memref<8x16xf32, #tpu.memory_space<vmem>>, vector<8x16xf32>
    %5 = arith.maximumf %1, %3 : vector<8x16xf32>
    %6 = arith.subf %1, %5 : vector<8x16xf32>
    %7 = math.exp %6 : vector<8x16xf32>
    %8 = arith.subf %3, %5 : vector<8x16xf32>
    %9 = math.exp %8 : vector<8x16xf32>
    %10 = arith.addf %7, %9 : vector<8x16xf32>
    %11 = math.log %10 : vector<8x16xf32>
    %12 = arith.addf %5, %11 : vector<8x16xf32>
    %13 = arith.subf %1, %12 : vector<8x16xf32>
    %14 = arith.subf %3, %12 : vector<8x16xf32>
    %15 = arith.mulf %4, %14 : vector<8x16xf32>
    %cst = arith.constant 1.000000e+00 : f32
    %16 = vector.broadcast %cst : f32 to vector<8x16xf32>
    %17 = arith.subf %16, %4 : vector<8x16xf32>
    %cst_6 = arith.constant 1.000000e-01 : f32
    %18 = vector.broadcast %cst_6 : f32 to vector<8x16xf32>
    %19 = arith.mulf %18, %17 : vector<8x16xf32>
    %20 = arith.mulf %19, %13 : vector<8x16xf32>
    %21 = arith.addf %15, %20 : vector<8x16xf32>
    %cst_7 = arith.constant 0.000000e+00 : f32
    %22 = vector.broadcast %cst_7 : f32 to vector<8x16xf32>
    %23 = arith.subf %22, %21 : vector<8x16xf32>
    %cst_8 = arith.constant dense<0.000000e+00> : vector<16xf32>
    %24 = vector.multi_reduction <add>, %23, %cst_8 [0] : vector<8x16xf32> to vector<16xf32>
    %25 = vector.shape_cast %24 : vector<16xf32> to vector<1x16xf32>
    %cst_9 = arith.constant 1.250000e-01 : f32
    %26 = vector.broadcast %cst_9 : f32 to vector<1x16xf32>
    %27 = arith.mulf %25, %26 : vector<1x16xf32>
    %c0_10 = arith.constant 0 : index
    %c0_11 = arith.constant 0 : index
    %28 = vector.load %arg3[%c0_10, %c0_11] : memref<1x16xf32, #tpu.memory_space<vmem>>, vector<1x16xf32>
    tpu.vector_store %arg3[%c0_10, %c0_11], %27 {strides = array<i32>} : memref<1x16xf32, #tpu.memory_space<vmem>>, vector<1x16xf32>,
    %29 = arith.cmpf ogt, %3, %1 : vector<8x16xf32>
    %30 = arith.extui %29 : vector<8x16xi1> to vector<8x16xi32>
    %31 = arith.sitofp %30 : vector<8x16xi32> to vector<8x16xf32>
    %cst_12 = arith.constant dense<0.000000e+00> : vector<16xf32>
    %32 = vector.multi_reduction <add>, %31, %cst_12 [0] : vector<8x16xf32> to vector<16xf32>
    %33 = vector.shape_cast %32 : vector<16xf32> to vector<1x16xf32>
    %c0_13 = arith.constant 0 : index
    %c0_14 = arith.constant 0 : index
    %34 = vector.load %arg4[%c0_13, %c0_14] : memref<1x16xf32, #tpu.memory_space<vmem>>, vector<1x16xf32>
    tpu.vector_store %arg4[%c0_13, %c0_14], %33 {strides = array<i32>} : memref<1x16xf32, #tpu.memory_space<vmem>>, vector<1x16xf32>,
    return
  }
  func.func @transform_0(%arg0: i32) -> (i32, i32, i32) {
    %c0_i32 = arith.constant 0 : i32
    %c0_i32_0 = arith.constant 0 : i32
    %c0_i32_1 = arith.constant 0 : i32
    return %c0_i32, %c0_i32_0, %arg0 : i32, i32, i32
  }
  func.func @transform_1(%arg0: i32) -> (i32, i32) {
    %c0_i32 = arith.constant 0 : i32
    %c0_i32_0 = arith.constant 0 : i32
    return %c0_i32, %arg0 : i32, i32
  }
  func.func @transform_2(%arg0: i32) -> (i32, i32) {
    %c0_i32 = arith.constant 0 : i32
    %c0_i32_0 = arith.constant 0 : i32
    return %c0_i32, %arg0 : i32, i32
  }
  func.func @transform_3(%arg0: i32) -> (i32, i32) {
    %c0_i32 = arith.constant 0 : i32
    %c0_i32_0 = arith.constant 0 : i32
    return %c0_i32, %arg0 : i32, i32
  }
}

</mosaic_0001>

<bundles_post_ra>
// kernel: tpu_custom_call.1
= control target key start
LH: loop header
LB: loop body
LE: loop exit
PB: predicated region body
PF: predicated region fallthrough
CT: control target
= control target key end

     0   :  { %9 = vsyncpa [#allocation3], 0  ;;  %s285_s0 = inlined_call_operand.hbm [shape: f32[2,8,16], index: 0, kind: input, shape index: {}]   ;;  %s286_s1 = inlined_call_operand.hbm [shape: f32[8,16], index: 1, kind: input, shape index: {}]   ;;  %s287_s2 = inlined_call_operand.hbm [shape: f32[1,16], index: 2, kind: output, shape index: {0}]   ;;  %s288_s3 = inlined_call_operand.hbm [shape: f32[1,16], index: 3, kind: output, shape index: {1}]  }
   0x1   :  { %10 = vsyncpa [#allocation6], 0 }
   0x2   :  { %11 = vsyncpa [#allocation4], 0 }
   0x3   :  { %12 = vsyncpa [#allocation9], 0  ;;  %s17_s14 = sshll.u32 %s285_s0, 4  ;;  %s242_s15 = smov [#allocation2]   ;;  %s18_s14 = int_to_ptr.hbm [resolvable:$true] %s17_s14 }
   0x4   :  { %s19_s16 = sshll.u32 %s242_s15, 4  ;;  %s31_s19 = sshll.u32 %s286_s1, 4  ;;  %s20_s16 = int_to_ptr.vmem [resolvable:$true] %s19_s16  ;;  %s32_s19 = int_to_ptr.hbm [resolvable:$true] %s31_s19 }
   0x5   :  { %s243_s20 = smov 128   ;;  %s244_s21 = smov 8  }
   0x6   :  { %25 = dma.hbm_to_vmem [thread:$0]  %s18_s14, 256, %s20_s16, [#allocation3], %s243_s20, %s243_s20, %s244_s21  }
   0x7   :  { %s245_s22 = smov [#allocation5]  }
   0x8   :  { %s33_s23 = sshll.u32 %s245_s22, 4  ;;  %s34_s23 = int_to_ptr.vmem [resolvable:$true] %s33_s23 }
   0x9   :  { %36 = dma.hbm_to_vmem [thread:$0]  %s32_s19, 128, %s34_s23, [#allocation6]  }
   0xa   :  { %234 = dma.done.wait [#allocation3], 256  }
   0xb   :  { %235 = vsyncadd [#allocation3], 4294967040 }
   0xc   :  { %236 = dma.done.wait [#allocation6], 128  }
   0xd   :  { %237 = vsyncadd [#allocation6], 4294967168  ;;  %v45_v0 = vld [vmem:[#allocation2] sm:$0xff]  ;;  %v47_v1 = vld [vmem:[#allocation2 + $0x8] sm:$0xff]  ;;  %vm68_vm1 = vcmask 130048   ;;  %v246_v7 = vmov 0.0  }
   0xe   :  { %v49_v2 = vmax.f32 %v45_v0, %v47_v1  ;;  %vm79_vm0 = vcmp.gt.f32.partialorder %v47_v1, %v45_v0  ;;  %s247_s0 = smov [#allocation8]   ;;  %s108_s26 = sshll.u32 %s288_s3, 4  ;;  %vm77_vm2 = vcmask 122880   ;;  %v48_v19 = vld [vmem:[#allocation5] sm:$0xff]  ;;  %s109_s26 = int_to_ptr.hbm [resolvable:$true] %s108_s26 }
   0xf   :  { %v124_v8 = vsel %vm79_vm0, 1.0, %v246_v7  ;;  %s106_s1 = sshll.u32 %s247_s0, 4  ;;  %v63_v20 = vsub.f32 1.0, %v48_v19  ;;  %s248_s3 = smov [#allocation7]   ;;  %s107_s1 = int_to_ptr.vmem [resolvable:$true] %s106_s1 }
  0x10   :  { %v50_v3 = vsub.f32 %v45_v0, %v49_v2  ;;  %v53_v4 = vsub.f32 %v47_v1, %v49_v2  ;;  %v82_v9 = vsel %vm68_vm1, %v124_v8, 0.0  ;;  %s95_s27 = sshll.u32 %s248_s3, 4  ;;  %s97_s30 = sshll.u32 %s287_s2, 4  ;;  %s96_s27 = int_to_ptr.vmem [resolvable:$true] %s95_s27  ;;  %s98_s30 = int_to_ptr.hbm [resolvable:$true] %s97_s30 }
  0x11   :  { %v83_v10 = vrot.slane %v82_v9, 4  ;;  %v64_v24 = vmul.f32 0.1, %v63_v20 }
  0x12   :  { %v51_v5 = vmul.f32 1.442695, %v50_v3  ;;  %v54_v6 = vmul.f32 1.442695, %v53_v4 }
  0x13   :  { %v84_v11 = vadd.f32 %v83_v10, %v82_v9 }
  0x14   :  { %132 = vpow2.f32 %v51_v5 }
  0x15   :  { %134 = vpow2.f32 %v54_v6  ;;  %v85_v12 = vrot.slane %v84_v11, 2 }
  0x17   :  { %v86_v14 = vadd.f32 %v85_v12, %v84_v11 }
  0x19   :  { %v87_v17 = vrot.slane %v86_v14, 1 }
  0x1a   :  { %v133_v13 = vpop.eup %132 }
  0x1b   :  { %v135_v15 = vpop.eup %134  ;;  %v88_v18 = vadd.f32 %v87_v17, %v86_v14 }
  0x1c   :  { %v56_v16 = vadd.f32 %v135_v15, %v133_v13 }
  0x1d   :  { %89 = vst.msk [vmem:[#allocation8] sm:$0x1] %vm77_vm2, %v88_v18 }
  0x1e   :  { %136 = vlog2.f32 %v56_v16  ;;  %111 = dma.vmem_to_hbm [thread:$0]  %s107_s1, 16, %s109_s26, [#allocation9]  }
  0x24   :  { %v137_v21 = vpop.eup %136 }
  0x25   :  { %v58_v22 = vmul.f32 0.6931472, %v137_v21 }
  0x27   :  { %v59_v23 = vadd.f32 %v58_v22, %v49_v2 }
  0x29   :  { %v60_v25 = vsub.f32 %v45_v0, %v59_v23  ;;  %v61_v26 = vsub.f32 %v47_v1, %v59_v23 }
  0x2b   :  { %v62_v27 = vmul.f32 %v61_v26, %v48_v19  ;;  %v65_v28 = vmul.f32 %v64_v24, %v60_v25 }
  0x2d   :  { %v66_v29 = vadd.f32 %v65_v28, %v62_v27 }
  0x2f   :  { %v67_v30 = vsub.f32 0.0, %v66_v29 }
  0x31   :  { %v69_v31 = vsel %vm68_vm1, %v67_v30, 0.0 }
  0x32   :  { %v70_v32 = vrot.slane %v69_v31, 4 }
  0x34   :  { %v71_v33 = vadd.f32 %v70_v32, %v69_v31 }
  0x36   :  { %v72_v34 = vrot.slane %v71_v33, 2 }
  0x38   :  { %v73_v35 = vadd.f32 %v72_v34, %v71_v33 }
  0x3a   :  { %v74_v36 = vrot.slane %v73_v35, 1 }
  0x3c   :  { %v75_v37 = vadd.f32 %v74_v36, %v73_v35 }
  0x3e   :  { %v76_v38 = vmul.f32 0.125, %v75_v37 }
  0x40   :  { %78 = vst.msk [vmem:[#allocation7] sm:$0x1] %vm77_vm2, %v76_v38 }
  0x41   :  { %100 = dma.vmem_to_hbm [thread:$0]  %s96_s27, 16, %s98_s30, [#allocation4]  }
  0x42   :  { %238 = dma.done.wait [#allocation4], 16  }
  0x43   :  { %239 = vsyncadd [#allocation4], 4294967280 }
  0x44   :  { %240 = dma.done.wait [#allocation9], 16  }
  0x45   :  { %241 = vsyncadd [#allocation9], 4294967280 }
  0x46   :  { %120 = vsyncpa [#allocation3], 1 }
  0x47   :  { %121 = vsyncpa [#allocation6], 1 }
  0x48   :  { %122 = vsyncpa [#allocation4], 1 }
  0x49   :  { %123 = vsyncpa [#allocation9], 1 }

</bundles_post_ra>
